<compile_context>
chip_gen: v6e
topology: v6e:2x2x1
jax: 0.10.0
libtpu: 0.0.40
codegen_flags: <defaults>
</compile_context>

<pallas_src>
import math

import jax
import jax.numpy as jnp
from jax.experimental import pallas as pl
from jax.experimental.pallas import tpu as pltpu


# ---------------- synthetic ElecInfo (deterministic, in-script) ----------------
# Orbital capacities in aufbau order: 1s 2s 2p 3s 3p 4s 3d
ORB_CAPS = (2, 2, 6, 2, 6, 2, 10)
N_ORB = len(ORB_CAPS)
MAX_Z = 20                                     # atomic numbers 0..MAX_Z (0 = dummy)
MAX_ELEC_IDX = tuple(c + 1 for c in ORB_CAPS)  # per-orbital embedding table sizes
MAX_E = max(MAX_ELEC_IDX)


def build_elec_table():
    """elec_table[z, i] = number of electrons in orbital i for atomic number z."""
    table = []
    for z in range(MAX_Z + 1):
        remaining = z
        row = []
        for cap in ORB_CAPS:
            e = min(remaining, cap)
            row.append(e)
            remaining -= e
        table.append(row)
    return jnp.asarray(table, dtype=jnp.int32)                  # (MAX_Z+1, N_ORB)


def build_embedding_weights(emb_size, key):
    """Packed embedding weights (N_ORB, MAX_E, emb_size), zero-padded per orbital.

    Matches nn.Embedding(max_e, emb_size).weight.uniform_(-sqrt(2), sqrt(2))
    followed by zeroing padding_idx=0 (extend_orb=False path).
    """
    w = jnp.zeros((N_ORB, MAX_E, emb_size), dtype=jnp.float32)
    for i, sz in enumerate(MAX_ELEC_IDX):
        key, sub = jax.random.split(key)
        wi = jax.random.uniform(sub, (sz, emb_size), jnp.float32,
                                minval=-math.sqrt(2.0), maxval=math.sqrt(2.0))
        wi = wi.at[0].set(0.0)                  # padding_idx = 0 -> zero vector
        w = w.at[i, :sz, :].set(wi)
    return w


def build_fused_table(elec_table, weights):
    """W3[z] = concat_i weights[i, elec_table[z, i], :]  -> (MAX_Z+1, n_orb*E).

    Collapses the elec_table gather and all per-orbital embedding lookups into one
    tiny z-indexed table (~19 KB at E=32). Row 0 (dummy atom) is all zeros because
    every orbital's padding row is zero.
    """
    n_orb, _, e = weights.shape
    w3 = weights[jnp.arange(n_orb)[None, :], elec_table]        # (n_z, n_orb, e)
    return w3.reshape(elec_table.shape[0], n_orb * e)


def _round_up(x, m):
    return -(-x // m) * m


# ---------------- Pallas kernel ----------------
# grid = (atom tiles,), marked "parallel".
#   z   block (TILE_N, 1)        int32  -- atomic numbers
#   w3  block (K_PAD, N_ORB*E)   f32    -- fused z-indexed table, VMEM-resident
#   out block (TILE_N, N_ORB*E)  f32    -- lane-dense output slab
def embed_elec_kernel(z_ref, w3_ref, out_ref):
    z = z_ref[...]                              # (TILE_N, 1) int32
    w3 = w3_ref[...]                            # (K_PAD, N_ORB*E) f32
    tile_n = z.shape[0]
    k_pad = w3.shape[0]

    # Single-pass one-hot: one 2-D iota + one compare (VPU). No per-orbital loop.
    iota = jax.lax.broadcasted_iota(jnp.int32, (tile_n, k_pad), 1)
    onehot = (iota == z).astype(jnp.float32)    # (TILE_N, K_PAD), values 0/1

    # One MXU matmul does every embedding gather. precision=HIGHEST keeps the f32
    # table rows exact (lhs is 0/1), so the output matches the f32 reference.
    out_ref[...] = jnp.dot(
        onehot, w3,
        preferred_element_type=jnp.float32,
        precision=jax.lax.Precision.HIGHEST,
    ).astype(out_ref.dtype)


def embed_elec_forward(z, elec_table, weights, *, tile_n_cap=4096):
    """z: (N,) int32 atomic numbers -> (N, N_ORB, emb_size) float32."""
    n_atom = z.shape[0]
    n_orb, _, emb_size = weights.shape
    out_w = n_orb * emb_size                    # lane-dense output width (224 at E=32)

    # Fused lookup table (tiny; in a real model cache this across calls).
    w3 = build_fused_table(elec_table, weights)                 # (MAX_Z+1, out_w)
    k_pad = _round_up(w3.shape[0], 8)
    if k_pad != w3.shape[0]:
        w3 = jnp.pad(w3, ((0, k_pad - w3.shape[0]), (0, 0)))    # zero rows, never hot

    # Balanced atom tiling: pad N to a multiple of 8, split into evenly sized tiles
    # (multiple of 8 rows each) so ragged N never pays a whole garbage tile, and use
    # >= 2 tiles when possible so the "parallel" axis covers both v7x TensorCores.
    n_pad8 = max(8, _round_up(n_atom, 8))
    min_tiles = 2 if n_pad8 >= 16 else 1
    num_tiles = max(min_tiles, pl.cdiv(n_pad8, tile_n_cap))
    tile_n = _round_up(pl.cdiv(n_pad8, num_tiles), 8)
    n_padded = tile_n * num_tiles

    # Padded atoms get z=0 -> W3 row 0 (all zeros); sliced off below.
    # NOTE: z > MAX_Z / z < 0 is out of contract (same as the torch module).
    z2 = z.astype(jnp.int32).reshape(n_atom, 1)
    if n_padded != n_atom:
        z2 = jnp.pad(z2, ((0, n_padded - n_atom), (0, 0)))

    cost = pl.CostEstimate(
        flops=2 * n_padded * k_pad * out_w,
        transcendentals=0,
        bytes_accessed=n_padded * out_w * 4 + n_padded * 4 + k_pad * out_w * 4,
    )

    out = pl.pallas_call(
        embed_elec_kernel,
        out_shape=jax.ShapeDtypeStruct((n_padded, out_w), jnp.float32),
        grid_spec=pltpu.PrefetchScalarGridSpec(
            num_scalar_prefetch=0,
            grid=(num_tiles,),
            in_specs=[
                pl.BlockSpec((tile_n, 1), lambda n: (n, 0)),
                # fused table resident in VMEM across all atom tiles
                pl.BlockSpec((k_pad, out_w), lambda n: (0, 0)),
            ],
            out_specs=pl.BlockSpec((tile_n, out_w), lambda n: (n, 0)),
        ),
        compiler_params=pltpu.CompilerParams(
            dimension_semantics=("parallel",),          # shard tiles across v7x's 2 TCs
            vmem_limit_bytes=32 * 1024 * 1024,          # ample for 4096-row tiles, safe on v7x
        ),
        cost_estimate=cost,
    )(z2, w3)                                   # (n_padded, n_orb*emb_size)

    # Free contiguous reshape into the (N, n_orb, emb_size) layout (no transpose).
    return out[:n_atom].reshape(n_atom, n_orb, emb_size)


if __name__ == "__main__":
    key = jax.random.PRNGKey(0)
    emb_size = 32
    n_atom = 20                                 # exercises padding + the 2-tile path

    elec_table = build_elec_table()
    k_w, k_z = jax.random.split(key)
    weights = build_embedding_weights(emb_size, k_w)
    z = jax.random.randint(k_z, (n_atom,), 1, MAX_Z + 1, dtype=jnp.int32)

    out = jax.block_until_ready(embed_elec_forward(z, elec_table, weights))

    # pure-JAX reference of the forward pass
    elec = elec_table[z]                                   # (N, N_ORB)
    ref = weights[jnp.arange(N_ORB)[None, :], elec]        # (N, N_ORB, E)

    assert out.shape == (n_atom, N_ORB, emb_size)
    assert out.dtype == jnp.float32
    assert jnp.allclose(out, ref, atol=1e-6)
    print("KERNEL_OK")
</pallas_src>

<mosaic_0001>
module attributes {stable_mosaic.version = 11 : i64} {
  func.func @embed_elec_kernel(%arg0: i32, %arg1: memref<16x1xi32, #tpu.memory_space<vmem>>, %arg2: memref<24x224xf32, #tpu.memory_space<vmem>>, %arg3: memref<16x224xf32, #tpu.memory_space<vmem>>) attributes {dimension_semantics = [#tpu.dimension_semantics<parallel>], iteration_bounds = array<i64: 2>, scalar_prefetch = 0 : i64, scratch_operands = 0 : i64, tpu.core_type = #tpu.core_type<tc>, window_params = [{transform_indices = @transform_0, window_bounds = array<i64: 16, 1>}, {pipeline_mode = #tpu.pipeline_mode<synchronous>, transform_indices = @transform_1, window_bounds = array<i64: 24, 224>}, {transform_indices = @transform_2, window_bounds = array<i64: 16, 224>}]} {
    %c0 = arith.constant 0 : index
    %c0_0 = arith.constant 0 : index
    %0 = vector.load %arg1[%c0, %c0_0] : memref<16x1xi32, #tpu.memory_space<vmem>>, vector<16x1xi32>
    %c0_1 = arith.constant 0 : index
    %c0_2 = arith.constant 0 : index
    %1 = vector.load %arg2[%c0_1, %c0_2] : memref<24x224xf32, #tpu.memory_space<vmem>>, vector<24x224xf32>
    %2 = tpu.iota {dimensions = array<i32: 1>} : vector<16x24xi32>
    %3 = vector.broadcast %0 : vector<16x1xi32> to vector<16x24xi32>
    %4 = arith.cmpi eq, %2, %3 : vector<16x24xi32>
    %5 = arith.extui %4 : vector<16x24xi1> to vector<16x24xi32>
    %6 = arith.sitofp %5 : vector<16x24xi32> to vector<16x24xf32>
    %cst = arith.constant dense<0.000000e+00> : vector<16x224xf32>
    %7 = tpu.matmul %6, %1, %cst {dimension_numbers = #tpu.dot_dimension_numbers<[1], [0], [0], [1], [0, 0, 1, 1], [], []>, precision = #tpu.contract_precision<fp32>} : vector<16x24xf32>, vector<24x224xf32>, vector<16x224xf32> -> vector<16x224xf32>
    %c0_3 = arith.constant 0 : index
    %c0_4 = arith.constant 0 : index
    %8 = vector.load %arg3[%c0_3, %c0_4] : memref<16x224xf32, #tpu.memory_space<vmem>>, vector<16x224xf32>
    tpu.vector_store %arg3[%c0_3, %c0_4], %7 {strides = array<i32>} : memref<16x224xf32, #tpu.memory_space<vmem>>, vector<16x224xf32>,
    return
  }
  func.func @transform_0(%arg0: i32) -> (i32, i32) {
    %c0_i32 = arith.constant 0 : i32
    %c0_i32_0 = arith.constant 0 : i32
    return %arg0, %c0_i32 : i32, i32
  }
  func.func @transform_1(%arg0: i32) -> (i32, i32) {
    %c0_i32 = arith.constant 0 : i32
    %c0_i32_0 = arith.constant 0 : i32
    %c0_i32_1 = arith.constant 0 : i32
    return %c0_i32, %c0_i32_0 : i32, i32
  }
  func.func @transform_2(%arg0: i32) -> (i32, i32) {
    %c0_i32 = arith.constant 0 : i32
    %c0_i32_0 = arith.constant 0 : i32
    return %arg0, %c0_i32 : i32, i32
  }
}

</mosaic_0001>

<bundles_post_ra>
// kernel: tpu_custom_call.1
= control target key start
LH: loop header
LB: loop body
LE: loop exit
PB: predicated region body
PF: predicated region fallthrough
CT: control target
= control target key end

     0   :  { %7 = vsyncpa [#allocation3], 0  ;;  %s1283_s0 = inlined_call_operand.vmem [shape: s32[32,1], index: 0, kind: input, shape index: {}]   ;;  %s1284_s1 = inlined_call_operand.hbm [shape: f32[24,224], index: 1, kind: input, shape index: {}]   ;;  %s1285_s2 = inlined_call_operand.hbm [shape: f32[32,224], index: 2, kind: output, shape index: {}]  }
   0x1   :  { %8 = vsyncpa [#allocation4], 0 }
   0x2   :  { %10 = vsyncpa [#allocation4 + $0x1], 0  ;;  %s1046_s9 = smov 0   ;;  %s1048_s10 = smov 0  }
   0x3   :  { %s1050_s11 = smov 0   ;;  %s1052_s12 = smov 0  }
   0x4 LB: > { %s1067_s13 = sadd.s32 4294967295, %s1021_s12   ;;  %s849_s14 = sadd.s32 4294967294, %s1021_s12   ;;  %s1021_s12 = sphi %s1052_s12, %s1293_s12   ;;  %s1017_s11 = sphi %s1050_s11, %s1292_s11   ;;  %s1013_s10 = sphi %s1048_s10, %s1291_s10   ;;  %s1009_s9 = sphi %s1046_s9, %s1290_s9  }
   0x5   : > { %s1071_s15 = sadd.s32 1, %s1021_s12   ;;  %s70_s16 = sadd.s32 1, %s1017_s11 }
   0x6   : > { %s67_s17 = ssub.s32 %s1021_s12, %s1071_s15  ;;  %p80_p0 = scmp.ne.s32.totalorder %s1017_s11, %s1013_s10 }
   0x7   : > { %p68_p1 = scmp.eq.s32.totalorder %s67_s17, 0  ;;  %p81_p2 = scmp.eq.s32.totalorder %s1067_s13, 1 }
   0x8   : > { %p86_p3 = scmp.ne.s32.totalorder %s1013_s10, %s1009_s9  ;;  %p87_p4 = scmp.eq.s32.totalorder %s849_s14, 1 }
   0x9   : > { %s1082_s18 = scalar_select %p68_p1, %s1017_s11, %s70_s16  }
   0xa   : > { %p1084_p5 = por %p81_p2, %p80_p0  ;;  %p1088_p6 = por %p87_p4, %p86_p3 }
   0xb   : > { %p850_p7 = scmp.ge.s32.totalorder %s1021_s12, 1  ;;  %p94_p8 = scmp.lt.s32.totalorder %s1021_s12, 3 }
   0xc   : > { %s1287_s20 = scalar_select %p1088_p6, 1, 0 }
   0xd   : > { %p888_p9 = scmp.eq.s32.totalorder %s1067_s13, 0  ;;  %p1095_p10 = pnand %p850_p7, %p94_p8 }
   0xe   : > { %s1023_s22 = smov [#allocation2]  }
   0xf   : > { %s106_s23 = sshll.u32 %s1023_s22, 4  ;;  %p880_p11 = pneg %p1095_p10  ;;  %s107_s23 = int_to_ptr.vmem [resolvable:$true] %s106_s23 }
  0x10   : > { %s942_s24 = scalar_lea.vmem %s107_s23, 768  ;;  %p950_p3 = scmp.lt.s32.totalorder %s107_s23, %s107_s23 }
  0x11   : > { %p881_p12 = pnand %p888_p9, %p880_p11  ;;  %p943_p0 = scmp.ne.s32.totalorder %s107_s23, %s942_s24 }
  0x12   : > { %p951_p4 = scmp.lt.s32.totalorder %s942_s24, %s942_s24 }
  0x13   : > { %p933_p13 = pneg %p881_p12 }
  0x14   : > { %p952_p6 = por %p951_p4, %p950_p3 }
  0x15   : > { %p945_p1 = pnand %p943_p0, %p933_p13 }
  0x17   : > { %p946_p2 = pneg %p945_p1 }
  0x19   : > { %p953_p7 = pnand %p952_p6, %p946_p2 }
  0x1b   : > { %956 = shalt.err (!%p953_p7)
}
  0x1c   : > { %s1024_s25 = smov 256   ;;  %s1025_s26 = smov 16  }
  0x1d   : > { %883 = dma.hbm_to_vmem [thread:$0]  (!%p881_p12), %s1284_s1, 768, %s107_s23, [#allocation3], %s1024_s25, %s1024_s25, %s1025_s26  }
  0x1e   : > { %131 = sbr.rel (%p1095_p10) target bundleno = 412 (0x19c), region = 28 }
  0x23   : > { %1000 = dma.done.wait (%p888_p9), [#allocation3], 768  }
  0x24   : > { %1002 = vsyncadd (%p888_p9), [#allocation3], 4294966528  ;;  %s856_s29 = sshll.u32 %s1067_s13, 1  ;;  %v1026_v0 = vmov 0   ;;  %v1027_v1 = vmov 0.0   ;;  %v167_v3 = vld [vmem:[#allocation2 + $0x28] sm:$0xff]  ;;  %v168_v40 = vlaneseq }
  0x25   : > { %930 = vset.pattern.permute.xlu0 %v1026_v0  ;;  %p154_p6 = scmp.lt.s32.totalorder %s856_s29, 3  ;;  %376 = vmatprep.mubr.f32.mxu1 %v1027_v1  ;;  %v1118_v4 = vand.u32 4294901760, %v167_v3  ;;  %v166_v5 = vld [vmem:[#allocation2 + $0x20] sm:$0xff]  ;;  %v165_v6 = vld [vmem:[#allocation2 + $0x18] sm:$0xff]  ;;  %v164_v7 = vld [vmem:[#allocation2 + $0x10] sm:$0xff]  ;;  %vm182_vm0 = vcmask 195584  }
  0x26   : > { %259 = vmatprep.mubr.f32.mxu0 %v1027_v1  ;;  %v1120_v9 = vand.u32 4294901760, %v166_v5  ;;  %v1122_v10 = vand.u32 4294901760, %v165_v6  ;;  %v1124_v11 = vand.u32 4294901760, %v164_v7  ;;  %v163_v12 = vld [vmem:[#allocation2 + $0x8] sm:$0xff]  ;;  %v162_v13 = vld [vmem:[#allocation2] sm:$0xff]  ;;  %v169_v41 = vand.u32 127, %v168_v40 }
  0x27   : > { %s1295_s29 = smov (!%p154_p6, %s856_s29), 3  ;;  %v1127_v14 = vsub.f32 %v167_v3, %v1118_v4  ;;  %v1129_v15 = vand.u32 4294901760, %v163_v12  ;;  %v1131_v16 = vand.u32 4294901760, %v162_v13  ;;  %216 = vmatprep.subr.mxu0 %v1118_v4  ;;  %s150_s6 = sand.u32 1, %s1013_s10   ;;  %vm756_vm3 = vcmask 785408  }
  0x28   : > { %s857_s30 = sshll.u32 %s1295_s29, 3  ;;  %v1135_v17 = vsub.f32 %v166_v5, %v1120_v9  ;;  %v1138_v18 = vsub.f32 %v165_v6, %v1122_v10  ;;  %v1141_v19 = vsub.f32 %v164_v7, %v1124_v11  ;;  %218 = vmatpush1.msra.mxu0 %v1120_v9  ;;  %s855_s7 = sshll.u32 %s150_s6, 5 }
  0x29   : > { %s157_s5 = scalar_lea.vmem %s1283_s0, %s857_s30  ;;  %v310_v20 = vand.u32 4294901760, %v1127_v14  ;;  %v1146_v21 = vsub.f32 %v163_v12, %v1129_v15  ;;  %v1149_v22 = vsub.f32 %v162_v13, %v1131_v16  ;;  %220 = vmatprep.subr.mxu0 %v1122_v10  ;;  %s152_s8 = scalar_lea.vmem [#allocation5], %s855_s7 }
  0x2a   : > { %v160_v2 = vld [vmem:[%s157_s5] sm:$0xff]  ;;  %v161_v8 = vld [vmem:[%s157_s5 + $0x8] sm:$0xff]  ;;  %v316_v23 = vand.u32 4294901760, %v1135_v17  ;;  %v322_v24 = vand.u32 4294901760, %v1138_v18  ;;  %v328_v25 = vand.u32 4294901760, %v1141_v19  ;;  %222 = vmatpush1.msra.mxu0 %v1124_v11  ;;  %s775_s14 = sshll.u32 %s152_s8, 4  ;;  %s1233_s14 = int_to_ptr.vmem [resolvable:$true] %s775_s14 }
  0x2b   : > { %171 = vperm.xlu0 %930, %v160_v2   ;;  %v311_v26 = vsub.f32 %v1127_v14, %v310_v20  ;;  %v334_v27 = vand.u32 4294901760, %v1146_v21  ;;  %v340_v28 = vand.u32 4294901760, %v1149_v22  ;;  %224 = vmatprep.subr.mxu0 %v1129_v15  ;;  %s873_s16 = sshll.u32 %s1067_s13, 9  ;;  %s1243_s13 = scalar_lea.sflag [#allocation4], %s150_s6 }
  0x2c   : > { %v317_v29 = vsub.f32 %v1135_v17, %v316_v23  ;;  %v323_v30 = vsub.f32 %v1138_v18, %v322_v24  ;;  %v329_v31 = vsub.f32 %v1141_v19, %v328_v25  ;;  %226 = vmatpush1.msra.mxu0 %v1131_v16  ;;  %s1238_s22 = scalar_lea.hbm %s1285_s2, %s873_s16  ;;  %s957_s23 = scalar_lea.vmem %s1233_s14, 512 }
  0x2d   : > { %v312_v32 = vand.u32 4294901760, %v311_v26  ;;  %v335_v33 = vsub.f32 %v1146_v21, %v334_v27  ;;  %v341_v34 = vsub.f32 %v1149_v22, %v340_v28  ;;  %419 = vmatprep.subr.mxu0 %v1127_v14  ;;  %p958_p8 = scmp.ne.s32.totalorder %s1233_s14, %s957_s23  ;;  %s1028_s24 = smov [#allocation5]  }
  0x2e   : > { %v318_v35 = vand.u32 4294901760, %v317_v29  ;;  %v324_v36 = vand.u32 4294901760, %v323_v30  ;;  %v330_v37 = vand.u32 4294901760, %v329_v31  ;;  %s961_s25 = sshll.u32 %s1028_s24, 4  ;;  %s962_s25 = int_to_ptr.vmem [resolvable:$false] %s961_s25 }
  0x2f   : > { %174 = vperm.xlu0 %930, %v161_v8   ;;  %313 = vmatprep.subr.mxu1 %v312_v32  ;;  %v336_v38 = vand.u32 4294901760, %v335_v33  ;;  %v342_v39 = vand.u32 4294901760, %v341_v34  ;;  %p959_p9 = pnand %p958_p8, %p1084_p5  ;;  %s963_s26 = scalar_lea.vmem %s962_s25, 1024 }
  0x30   : > { %319 = vmatpush1.msra.mxu1 %v318_v35  ;;  %p964_p11 = scmp.lt.s32.totalorder %s1233_s14, %s962_s25  ;;  %p965_p12 = scmp.lt.s32.totalorder %s963_s26, %s957_s23 }
  0x31   : > { %325 = vmatprep.subr.mxu1 %v324_v36  ;;  %p960_p10 = pneg %p959_p9 }
  0x32   : > { %331 = vmatpush1.msra.mxu1 %v330_v37  ;;  %p966_p13 = por %p965_p12, %p964_p11 }
  0x33   : > { %337 = vmatprep.subr.mxu1 %v336_v38 }
  0x34   : > { %343 = vmatpush1.msra.mxu1 %v342_v39  ;;  %p967_p0 = pnand %p966_p13, %p960_p10 }
  0x35   : > { %511 = vmatprep.subr.mxu1 %v1118_v4 }
  0xa6   : > { %v172_v42 = vpop.permute.xlu0 %171 }
  0xa7   : > { %vm176_vm1 = vcmp.eq.s32.totalorder %v169_v41, %v172_v42 }
  0xa8   : > { %v858_v43 = vsel %vm176_vm1, 1.0, %v1027_v1 }
  0xa9   : > { %v184_v44 = vsel %vm182_vm0, %v858_v43, 0  ;;  %860 = vmatmul.mubr.msk.f32.vlgmr.msra.gmra.mxu1 %vm182_vm0, %v858_v43 }
  0xaa   : > { %v261_v45 = vsub.f32 %v184_v44, %v184_v44  ;;  %v175_v46 = vpop.permute.xlu0 %174  ;;  %383 = vmatprep.mubr.f32.mxu1 %v1027_v1  ;;  %513 = vmatpush1.msra.mxu1 %v1120_v9 }
  0xab   : > { %vm177_vm2 = vcmp.eq.s32.totalorder %v169_v41, %v175_v46  ;;  %515 = vmatprep.subr.mxu1 %v1122_v10 }
  0xac   : > { %v262_v47 = vand.u32 4294901760, %v261_v45  ;;  %v859_v48 = vsel %vm177_vm2, 1.0, %v1027_v1  ;;  %517 = vmatpush1.msra.mxu1 %v1124_v11 }
  0xad   : > { %v187_v49 = vsel %vm182_vm0, %v859_v48, 0  ;;  %861 = vmatmul.mubr.msk.f32.gmra.mxu1 %vm182_vm0, %v859_v48  ;;  %519 = vmatprep.subr.mxu1 %v1129_v15 }
  0xae   : > { %v272_v50 = vsub.f32 %v187_v49, %v187_v49  ;;  %521 = vmatpush1.msra.mxu1 %v1131_v16  ;;  %554 = vmatprep.mubr.f32.mxu1 %v1027_v1  ;;  %v263_v51 = vsub.f32 %v261_v45, %v262_v47 }
  0xaf   : > { %697 = vmatprep.subr.mxu1 %v1118_v4 }
  0xb0   : > { %v264_v52 = vand.u32 4294901760, %v263_v51  ;;  %v273_v53 = vand.u32 4294901760, %v272_v50 }
  0xb1   : > { %558 = vmatmul.mubr.f32.vlgmr.msra.gmra.mxu1 %v262_v47 }
  0xb2   : > { %265 = vmatmul.mubr.f32.vlgmr.msra.gmra.mxu0 %v264_v52  ;;  %563 = vmatprep.mubr.f32.mxu1 %v1027_v1  ;;  %v274_v54 = vsub.f32 %v272_v50, %v273_v53 }
  0xb3   : > { %422 = vmatpush1.msra.mxu0 %v1135_v17  ;;  %699 = vmatpush1.msra.mxu1 %v1120_v9 }
  0xb4   : > { %425 = vmatprep.subr.mxu0 %v1138_v18  ;;  %270 = vmatprep.mubr.f32.mxu0 %v1027_v1  ;;  %v275_v55 = vand.u32 4294901760, %v274_v54 }
  0xb5   : > { %428 = vmatpush1.msra.mxu0 %v1141_v19  ;;  %567 = vmatmul.mubr.f32.gmra.mxu1 %v273_v53 }
  0xb6   : > { %701 = vmatprep.subr.mxu1 %v1122_v10  ;;  %276 = vmatmul.mubr.f32.gmra.mxu0 %v275_v55 }
  0xb7   : > { %703 = vmatpush1.msra.mxu1 %v1124_v11  ;;  %431 = vmatprep.subr.mxu0 %v1146_v21 }
  0xb8   : > { %705 = vmatprep.subr.mxu1 %v1129_v15  ;;  %434 = vmatpush1.msra.mxu0 %v1149_v22 }
  0xb9   : > { %707 = vmatpush1.msra.mxu1 %v1131_v16  ;;  %740 = vmatprep.mubr.f32.mxu1 %v1027_v1 }
  0xba   : > { %467 = vmatprep.mubr.f32.mxu0 %v1027_v1  ;;  %602 = vmatprep.subr.mxu0 %v310_v20 }
  0xbb   : > { %864 = vmatmul.mubr.msk.f32.vlgmr.msra.gmra.mxu1 %vm182_vm0, %v858_v43  ;;  %470 = vmatmul.mubr.f32.vlgmr.msra.gmra.mxu0 %v261_v45 }
  0xbc   : > { %606 = vmatpush1.msra.mxu0 %v316_v23  ;;  %747 = vmatprep.mubr.f32.mxu1 %v1027_v1 }
  0xbd   : > { %610 = vmatprep.subr.mxu0 %v322_v24  ;;  %475 = vmatprep.mubr.f32.mxu0 %v1027_v1 }
  0xbe   : > { %614 = vmatpush1.msra.mxu0 %v328_v25 }
  0xbf   : > { %865 = vmatmul.mubr.msk.f32.gmra.mxu1 %vm182_vm0, %v859_v48  ;;  %478 = vmatmul.mubr.f32.gmra.mxu0 %v272_v50 }
  0xc0   : > { %618 = vmatprep.subr.mxu0 %v334_v27  ;;  %655 = vmatprep.mubr.f32.mxu0 %v1027_v1 }
  0xc1   : > { %622 = vmatpush1.msra.mxu0 %v340_v28 }
  0xc3   : > { %862 = vmatmul.mubr.msk.f32.vlgmr.msra.gmra.mxu0 %vm182_vm0, %v858_v43 }
  0xc4   : > { %662 = vmatprep.mubr.f32.mxu0 %v1027_v1 }
  0xc7   : > { %863 = vmatmul.mubr.msk.f32.gmra.mxu0 %vm182_vm0, %v859_v48 }
 0x169   : > { %v379_v56 = vpop.f32.mrf.mxu1 }
 0x16b   : > { %v381_v57 = vpop.f32.mrf.mxu1 }
 0x16d   : > { %v386_v58 = vpop.f32.mrf.mxu1 }
 0x16f   : > { %v388_v59 = vpop.f32.mrf.mxu1 }
 0x171   : > { %v559_v60 = vpop.f32.mrf.mxu1 }
 0x172   : > { %v266_v61 = vpop.f32.mrf.mxu0 }
 0x173   : > { %v561_v62 = vpop.f32.mrf.mxu1  ;;  %v380_v6 = vadd.f32 %v379_v56, %v266_v61 }
 0x174   : > { %v268_v63 = vpop.f32.mrf.mxu0 }
 0x175   : > { %v568_v2 = vpop.f32.mrf.mxu1  ;;  %v382_v1 = vadd.f32 %v381_v57, %v268_v63 }
 0x176   : > { %v277_v0 = vpop.f32.mrf.mxu0 }
 0x177   : > { %v570_v4 = vpop.f32.mrf.mxu1  ;;  %v387_v11 = vadd.f32 %v386_v58, %v277_v0 }
 0x178   : > { %v279_v3 = vpop.f32.mrf.mxu0 }
 0x179   : > { %v389_v14 = vadd.f32 %v388_v59, %v279_v3 }
 0x17b   : > { %v471_v5 = vpop.f32.mrf.mxu0  ;;  %v743_v9 = vpop.f32.mrf.mxu1 }
 0x17c   : > { %v472_v8 = vadd.f32 %v471_v5, %v380_v6 }
 0x17d   : > { %v473_v7 = vpop.f32.mrf.mxu0  ;;  %v745_v17 = vpop.f32.mrf.mxu1 }
 0x17e   : > { %v474_v12 = vadd.f32 %v473_v7, %v382_v1  ;;  %v560_v16 = vadd.f32 %v559_v60, %v472_v8 }
 0x17f   : > { %v479_v10 = vpop.f32.mrf.mxu0  ;;  %v750_v26 = vpop.f32.mrf.mxu1 }
 0x180   : > { %v480_v15 = vadd.f32 %v479_v10, %v387_v11  ;;  %v562_v21 = vadd.f32 %v561_v62, %v474_v12 }
 0x181   : > { %v481_v13 = vpop.f32.mrf.mxu0  ;;  %v752_v34 = vpop.f32.mrf.mxu1 }
 0x182   : > { %v482_v19 = vadd.f32 %v481_v13, %v389_v14  ;;  %v569_v25 = vadd.f32 %v568_v2, %v480_v15 }
 0x183   : > { %v658_v18 = vpop.f32.mrf.mxu0 }
 0x184   : > { %v659_v20 = vadd.f32 %v658_v18, %v560_v16  ;;  %v571_v30 = vadd.f32 %v570_v4, %v482_v19 }
 0x185   : > { %v660_v22 = vpop.f32.mrf.mxu0 }
 0x186   : > { %v744_v23 = vadd.f32 %v743_v9, %v659_v20  ;;  %v661_v24 = vadd.f32 %v660_v22, %v562_v21 }
 0x187   : > { %v665_v27 = vpop.f32.mrf.mxu0 }
 0x188   : > { %755 = vst [vmem:[%s152_s8] sm:$0xff] %v744_v23  ;;  %v746_v28 = vadd.f32 %v745_v17, %v661_v24  ;;  %v666_v29 = vadd.f32 %v665_v27, %v569_v25 }
 0x189   : > { %v667_v31 = vpop.f32.mrf.mxu0 }
 0x18a   : > { %757 = vst.msk [vmem:[%s152_s8 + $0x8] sm:$0xff] %vm756_vm3, %v746_v28  ;;  %v751_v32 = vadd.f32 %v750_v26, %v666_v29  ;;  %v668_v33 = vadd.f32 %v667_v31, %v571_v30 }
 0x18c   : > { %758 = vst [vmem:[%s152_s8 + $0x10] sm:$0xff] %v751_v32  ;;  %v753_v35 = vadd.f32 %v752_v34, %v668_v33 }
 0x18e   : > { %759 = vst.msk [vmem:[%s152_s8 + $0x18] sm:$0xff] %vm756_vm3, %v753_v35 }
 0x18f   : > { %970 = shalt.err (!%p967_p0)
}
 0x190   : > { %s971_s27 = scalar_lea.hbm %s1238_s22, 512  ;;  %s975_s30 = scalar_lea.hbm %s1285_s2, 1024 }
 0x191   : > { %p972_p1 = scmp.ne.s32.totalorder %s1238_s22, %s971_s27  ;;  %p976_p4 = scmp.lt.s32.totalorder %s1238_s22, %s1285_s2 }
 0x192   : > { %p977_p7 = scmp.lt.s32.totalorder %s975_s30, %s971_s27 }
 0x193   : > { %p973_p2 = pnand %p972_p1, %p1084_p5 }
 0x194   : > { %p978_p6 = por %p977_p7, %p976_p4 }
 0x195   : > { %p974_p3 = pneg %p973_p2 }
 0x197   : > { %p979_p8 = pnand %p978_p6, %p974_p3 }
 0x199   : > { %982 = shalt.err (!%p979_p8)
}
 0x19a   : > { %s1029_s5 = smov 256   ;;  %s1030_s6 = smov 16  }
 0x19b   : > { %878 = dma.vmem_to_hbm [thread:$0]  (%p1084_p5), %s1233_s14, 512, %s1238_s22, %s1243_s13, %s1029_s5, %s1029_s5, %s1030_s6  }
 0x19c PF: > { %p890_p9 = scmp.ge.s32.totalorder %s1021_s12, 2  ;;  %s790_s7 = sand.u32 1, %s1009_s9  }
 0x19d   : > { %p1289_p10 = scmp.ne.s32.totalorder %s1287_s20, 0  ;;  %s791_s8 = scalar_lea.sflag [#allocation4], %s790_s7 }
 0x19f   : > { %p885_p11 = pnand %p890_p9, %p1289_p10 }
 0x1a1   : > { %p886_p12 = pneg %p885_p11 }
 0x1a3   : > { %1004 = dma.done.wait (%p886_p12), %s791_s8, 512  }
 0x1a4   : > { %1006 = vsyncadd (%p886_p12), %s791_s8, 4294966784  ;;  %p13_p13 = scmp.ge.s32.totalorder %s1071_s15, 4   ;;  %s1290_s9 = smov %s1013_s10 }
 0x1a5   : > { %s1291_s10 = smov %s1017_s11  ;;  %s1292_s11 = smov %s1082_s18 }
 0x1a6   : > { %s1293_s12 = smov %s1071_s15  ;;  %15 = sbr.rel (!%p13_p13) target bundleno = 4 (0x4), region = 68 }
 0x1ab   :  { %796 = vsyncpa [#allocation3], 1 }
 0x1ac   :  { %798 = vsyncpa [#allocation3 + $0x1], 1 }
 0x1ad   :  { %799 = vsyncpa [#allocation4], 1 }
 0x1ae   :  { %801 = vsyncpa [#allocation4 + $0x1], 1 }

</bundles_post_ra>
